<compile_context>
chip_gen: v5e
topology: v5e:2x2
jax: 0.10.0
libtpu: 0.0.40
codegen_flags: <defaults>
</compile_context>

<pallas_src>
import functools

import jax
import jax.numpy as jnp
from jax.experimental import pallas as pl
from jax.experimental.pallas import tpu as pltpu


def _round_up(n, m):
    return ((n + m - 1) // m) * m


def _mlp_kernel(x_ref, w1_ref, b1_ref, w2_ref, b2_ref, o_ref,
                h_acc, h_act, y_acc, *, nj, tj, to):
    # Grid: (i: batch tiles, k: hidden tiles, t: fused phase axis of length nj+no)
    #   t in [0, nj)      -> layer-1 partial for input tile j = t
    #   t in [nj, nj+no)  -> layer-2 partial for output tile o = t - nj
    k = pl.program_id(1)
    t = pl.program_id(2)
    nk = pl.num_programs(1)

    # ---------------- phase 1: layer-1 reduction over input-feature tiles ----
    @pl.when(t == 0)
    def _():
        h_acc[...] = jnp.zeros_like(h_acc)

    @pl.when(t < nj)
    def _():
        j0 = pl.multiple_of(t * tj, 128)
        x_blk = x_ref[:, pl.ds(j0, tj)]              # resident stripe, sliced
        h_acc[...] += jnp.dot(x_blk, w1_ref[...],    # [tm,tj] @ [tj,tk]
                              preferred_element_type=jnp.float32)

    # Bias + ReLU exactly once per hidden tile; store in the MXU compute dtype.
    @pl.when(t == nj - 1)
    def _():
        h_act[...] = jnp.maximum(h_acc[...] + b1_ref[...], 0.0).astype(h_act.dtype)

    # ---------------- phase 2: layer-2 accumulation over hidden tiles --------
    @pl.when(t >= nj)
    def _():
        o0 = pl.multiple_of((t - nj) * to, 128)
        part = jnp.dot(h_act[...], w2_ref[...],      # [tm,tk] @ [tk,to]
                       preferred_element_type=jnp.float32)

        @pl.when(k == 0)
        def _():
            y_acc[:, pl.ds(o0, to)] = part

        @pl.when(k > 0)
        def _():
            y_acc[:, pl.ds(o0, to)] += part

        # Finalize: output bias added exactly once, lane-dense store.
        @pl.when(k == nk - 1)
        def _():
            o_ref[...] = (y_acc[:, pl.ds(o0, to)] + b2_ref[...]).astype(o_ref.dtype)


def prepare_gpt_params(w1, b1, w2, b2, *, tk=512, tj=512, to=1024, dtype=None):
    """One-time parameter setup (call at init time, NOT per forward call).

    Transposes nn.Linear [out, in] weights to canonical [K, N] layout and
    zero-pads feature dims to lane/MXU-friendly multiples of 128.  Optionally
    casts parameters to `dtype` (e.g. jnp.bfloat16 for v6e/v7x throughput).
    """
    H, I = w1.shape
    O, H2 = w2.shape
    assert H2 == H and b1.shape == (H,) and b2.shape == (O,)
    if dtype is not None:
        w1, b1, w2, b2 = (a.astype(dtype) for a in (w1, b1, w2, b2))

    tk = min(tk, _round_up(H, 128))   # hidden tile
    tj = min(tj, _round_up(I, 128))   # input-feature tile
    to = min(to, _round_up(O, 128))   # output-feature tile
    Hpad = _round_up(H, tk)
    Ipad = _round_up(I, tj)
    Opad = _round_up(O, to)

    # One-time transpose (NOT on the forward hot path): W1 -> [I, H], W2 -> [H, O].
    w1_p = jnp.pad(w1.T, ((0, Ipad - I), (0, Hpad - H)))
    b1_p = jnp.pad(b1, (0, Hpad - H)).reshape(1, Hpad)
    w2_p = jnp.pad(w2.T, ((0, Hpad - H), (0, Opad - O)))
    b2_p = jnp.pad(b2, (0, Opad - O)).reshape(1, Opad)

    meta = dict(I=I, H=H, O=O, Ipad=Ipad, Hpad=Hpad, Opad=Opad,
                tk=tk, tj=tj, to=to, dtype=w1_p.dtype)
    return (w1_p, b1_p, w2_p, b2_p), meta


def gpt_forward(x, params, meta, *, tm=512):
    """x: [B, I] -> [B, O], matching PyTorch GPT.forward semantics."""
    w1_p, b1_p, w2_p, b2_p = params
    B, I = x.shape
    assert I == meta["I"]
    Ipad, Hpad, Opad = meta["Ipad"], meta["Hpad"], meta["Opad"]
    tk, tj, to = meta["tk"], meta["tj"], meta["to"]
    cdt = meta["dtype"]                       # compute dtype (MXU input dtype)

    tm = min(tm, _round_up(B, 8))             # batch tile (sublane-aligned)
    # Megacore (v7x): if the whole batch fits one tile, halve it so nb >= 2 and
    # both TensorCores get work on the "parallel" batch axis.
    if _round_up(B, tm) // tm < 2 and tm >= 256:
        tm = _round_up(tm // 2, 8)
    Bpad = _round_up(B, tm)

    # Only the activations are padded / cast per call.
    x_p = jnp.pad(x.astype(cdt), ((0, Bpad - B), (0, Ipad - I)))

    nb, nk, nj, no = Bpad // tm, Hpad // tk, Ipad // tj, Opad // to
    nt = nj + no

    itemsize_c = jnp.dtype(cdt).itemsize
    itemsize_o = jnp.dtype(x.dtype).itemsize

    # Cost estimate reflecting actual traffic: x read once, weights read nb
    # times (once per batch tile), output written once.
    flops = 2 * Bpad * Ipad * Hpad + 2 * Bpad * Hpad * Opad
    bytes_accessed = int(
        x_p.size * itemsize_c
        + nb * (w1_p.size + b1_p.size + w2_p.size + b2_p.size) * itemsize_c
        + Bpad * Opad * itemsize_o)

    # VMEM budget: double-buffered blocks + single-copy scratch, with headroom.
    vmem_bytes = (
        2 * tm * Ipad * itemsize_c            # resident x stripe
        + 2 * tj * tk * itemsize_c            # W1 tile
        + 2 * tk * itemsize_c                 # b1 tile
        + 2 * tk * to * itemsize_c            # W2 tile
        + 2 * to * itemsize_c                 # b2 tile
        + 2 * tm * to * itemsize_o            # out tile
        + tm * tk * 4                         # layer-1 f32 accumulator
        + tm * tk * itemsize_c                # activated hidden tile
        + tm * Opad * 4)                      # layer-2 f32 accumulator
    vmem_limit = int(min(128 * 1024 * 1024,
                         max(32 * 1024 * 1024, int(vmem_bytes * 1.3))))

    kernel = functools.partial(_mlp_kernel, nj=nj, tj=tj, to=to)

    out_p = pl.pallas_call(
        kernel,
        out_shape=jax.ShapeDtypeStruct((Bpad, Opad), x.dtype),
        grid=(nb, nk, nt),
        in_specs=[
            # x row-stripe: resident across the whole (k, t) sweep, read once.
            pl.BlockSpec((tm, Ipad), lambda i, k, t: (i, 0)),
            # W1 [I, H]: streamed in (tj, tk) tiles during phase 1, pinned after.
            pl.BlockSpec((tj, tk), lambda i, k, t: (jnp.minimum(t, nj - 1), k)),
            # b1 [1, H]
            pl.BlockSpec((1, tk), lambda i, k, t: (0, k)),
            # W2 [H, O]: pinned during phase 1, streamed in (tk, to) tiles after.
            pl.BlockSpec((tk, to), lambda i, k, t: (k, jnp.maximum(t - nj, 0))),
            # b2 [1, O]
            pl.BlockSpec((1, to), lambda i, k, t: (0, jnp.maximum(t - nj, 0))),
        ],
        # Pin the output block until the last k sweep so each (tm, to) block is
        # written back to HBM exactly once, with final data.
        out_specs=pl.BlockSpec(
            (tm, to),
            lambda i, k, t: (i, jnp.where(k == nk - 1, jnp.maximum(t - nj, 0), 0))),
        scratch_shapes=[
            pltpu.VMEM((tm, tk), jnp.float32),     # layer-1 f32 accumulator
            pltpu.VMEM((tm, tk), cdt),             # relu(h) in MXU dtype
            pltpu.VMEM((tm, Opad), jnp.float32),   # layer-2 f32 accumulator
        ],
        compiler_params=pltpu.CompilerParams(
            dimension_semantics=("parallel", "arbitrary", "arbitrary"),
            vmem_limit_bytes=vmem_limit),
        cost_estimate=pl.CostEstimate(
            flops=flops, transcendentals=0, bytes_accessed=bytes_accessed),
    )(x_p, w1_p, b1_p, w2_p, b2_p)

    return out_p[:B, :meta["O"]]


if __name__ == "__main__":
    key = jax.random.PRNGKey(0)

    def make_case(k, B, I, H, O):
        kx, kw1, kb1, kw2, kb2 = jax.random.split(k, 5)
        x = jax.random.normal(kx, (B, I), dtype=jnp.float32)
        w1 = jax.random.normal(kw1, (H, I), dtype=jnp.float32) * 0.1
        b1 = jax.random.normal(kb1, (H,), dtype=jnp.float32) * 0.1
        w2 = jax.random.normal(kw2, (O, H), dtype=jnp.float32) * 0.1
        b2 = jax.random.normal(kb2, (O,), dtype=jnp.float32) * 0.1
        return x, w1, b1, w2, b2

    def ref_fwd(x, w1, b1, w2, b2):
        return jnp.maximum(x @ w1.T + b1, 0.0) @ w2.T + b2

    k1, k2, k3 = jax.random.split(key, 3)

    # Case 1: tiny shapes consistent with the module (single tile per axis).
    x, w1, b1, w2, b2 = make_case(k1, 8, 32, 64, 16)
    params, meta = prepare_gpt_params(w1, b1, w2, b2)
    out = jax.block_until_ready(gpt_forward(x, params, meta))
    ref = ref_fwd(x, w1, b1, w2, b2)
    assert out.shape == ref.shape
    assert jnp.allclose(out, ref, atol=2e-2, rtol=2e-2), float(jnp.max(jnp.abs(out - ref)))

    # Case 2: non-aligned shapes exercising multi-tile batch / hidden / input
    # reductions and the padding path (nb=3, nk=3, nj=2, no=1).
    x, w1, b1, w2, b2 = make_case(k2, 48, 160, 640, 72)
    params, meta = prepare_gpt_params(w1, b1, w2, b2, tk=256, tj=128, to=128)
    out = jax.block_until_ready(gpt_forward(x, params, meta, tm=16))
    ref = ref_fwd(x, w1, b1, w2, b2)
    assert out.shape == ref.shape
    assert jnp.allclose(out, ref, atol=2e-2, rtol=2e-2), float(jnp.max(jnp.abs(out - ref)))

    # Case 3: bf16 compute path (v6e/v7x throughput mode), f32 accumulation.
    x, w1, b1, w2, b2 = make_case(k3, 32, 96, 256, 48)
    params, meta = prepare_gpt_params(w1, b1, w2, b2, tk=128, tj=128, to=128,
                                      dtype=jnp.bfloat16)
    out = jax.block_until_ready(gpt_forward(x, params, meta, tm=32))
    ref = ref_fwd(x, w1, b1, w2, b2)
    assert out.shape == ref.shape
    assert jnp.allclose(out, ref, atol=2e-1, rtol=1e-1), float(jnp.max(jnp.abs(out - ref)))

    print("KERNEL_OK")
</pallas_src>

<mosaic_0001>
module attributes {stable_mosaic.version = 11 : i64} {
  func.func @_mlp_kernel(%arg0: i32, %arg1: i32, %arg2: i32, %arg3: memref<8x128xf32, #tpu.memory_space<vmem>>, %arg4: memref<128x128xf32, #tpu.memory_space<vmem>>, %arg5: memref<1x128xf32, #tpu.memory_space<vmem>>, %arg6: memref<128x128xf32, #tpu.memory_space<vmem>>, %arg7: memref<1x128xf32, #tpu.memory_space<vmem>>, %arg8: memref<8x128xf32, #tpu.memory_space<vmem>>, %arg9: memref<8x128xf32, #tpu.memory_space<vmem>>, %arg10: memref<8x128xf32, #tpu.memory_space<vmem>>, %arg11: memref<8x128xf32, #tpu.memory_space<vmem>>) attributes {dimension_semantics = [#tpu.dimension_semantics<parallel>, #tpu.dimension_semantics<arbitrary>, #tpu.dimension_semantics<arbitrary>], iteration_bounds = array<i64: 1, 1, 2>, scalar_prefetch = 0 : i64, scratch_operands = 3 : i64, tpu.core_type = #tpu.core_type<tc>, window_params = [{transform_indices = @transform_0, window_bounds = array<i64: 8, 128>}, {transform_indices = @transform_1, window_bounds = array<i64: 128, 128>}, {transform_indices = @transform_2, window_bounds = array<i64: 1, 128>}, {transform_indices = @transform_3, window_bounds = array<i64: 128, 128>}, {transform_indices = @transform_4, window_bounds = array<i64: 1, 128>}, {transform_indices = @transform_5, window_bounds = array<i64: 8, 128>}]} {
    %c0_i32 = arith.constant 0 : i32
    %0 = arith.cmpi eq, %arg2, %c0_i32 : i32
    %1 = arith.extui %0 : i1 to i32
    %c0_i32_0 = arith.constant 0 : i32
    %2 = arith.cmpi ne, %1, %c0_i32_0 : i32
    scf.if %2 {
      %cst = arith.constant 0.000000e+00 : f32
      %12 = vector.broadcast %cst : f32 to vector<8x128xf32>
      %c0 = arith.constant 0 : index
      %c0_6 = arith.constant 0 : index
      %13 = vector.load %arg9[%c0, %c0_6] : memref<8x128xf32, #tpu.memory_space<vmem>>, vector<8x128xf32>
      tpu.vector_store %arg9[%c0, %c0_6], %12 {strides = array<i32>} : memref<8x128xf32, #tpu.memory_space<vmem>>, vector<8x128xf32>,
    } else {
    }
    %c1_i32 = arith.constant 1 : i32
    %3 = arith.cmpi slt, %arg2, %c1_i32 : i32
    %4 = arith.extui %3 : i1 to i32
    %c0_i32_1 = arith.constant 0 : i32
    %5 = arith.cmpi ne, %4, %c0_i32_1 : i32
    scf.if %5 {
      %c128_i32 = arith.constant 128 : i32
      %12 = arith.muli %arg2, %c128_i32 : i32
      %13 = tpu.assume_multiple %12, 128 : i32
      %c0 = arith.constant 0 : index
      %14 = arith.index_cast %13 : i32 to index
      %15 = vector.load %arg3[%c0, %14] : memref<8x128xf32, #tpu.memory_space<vmem>>, vector<8x128xf32>
      %c0_6 = arith.constant 0 : index
      %c0_7 = arith.constant 0 : index
      %16 = vector.load %arg9[%c0_6, %c0_7] : memref<8x128xf32, #tpu.memory_space<vmem>>, vector<8x128xf32>
      %c0_8 = arith.constant 0 : index
      %c0_9 = arith.constant 0 : index
      %17 = vector.load %arg4[%c0_8, %c0_9] : memref<128x128xf32, #tpu.memory_space<vmem>>, vector<128x128xf32>
      %cst = arith.constant dense<0.000000e+00> : vector<8x128xf32>
      %18 = tpu.matmul %15, %17, %cst {dimension_numbers = #tpu.dot_dimension_numbers<[1], [0], [0], [1], [0, 0, 1, 1], [], []>} : vector<8x128xf32>, vector<128x128xf32>, vector<8x128xf32> -> vector<8x128xf32>
      %19 = arith.addf %16, %18 : vector<8x128xf32>
      %c0_10 = arith.constant 0 : index
      %c0_11 = arith.constant 0 : index
      %20 = vector.load %arg9[%c0_10, %c0_11] : memref<8x128xf32, #tpu.memory_space<vmem>>, vector<8x128xf32>
      tpu.vector_store %arg9[%c0_10, %c0_11], %19 {strides = array<i32>} : memref<8x128xf32, #tpu.memory_space<vmem>>, vector<8x128xf32>,
    } else {
    }
    %c0_i32_2 = arith.constant 0 : i32
    %6 = arith.cmpi eq, %arg2, %c0_i32_2 : i32
    %7 = arith.extui %6 : i1 to i32
    %c0_i32_3 = arith.constant 0 : i32
    %8 = arith.cmpi ne, %7, %c0_i32_3 : i32
    scf.if %8 {
      %c0 = arith.constant 0 : index
      %c0_6 = arith.constant 0 : index
      %12 = vector.load %arg9[%c0, %c0_6] : memref<8x128xf32, #tpu.memory_space<vmem>>, vector<8x128xf32>
      %c0_7 = arith.constant 0 : index
      %c0_8 = arith.constant 0 : index
      %13 = vector.load %arg5[%c0_7, %c0_8] : memref<1x128xf32, #tpu.memory_space<vmem>>, vector<1x128xf32>
      %14 = vector.broadcast %13 : vector<1x128xf32> to vector<8x128xf32>
      %15 = arith.addf %12, %14 : vector<8x128xf32>
      %cst = arith.constant 0.000000e+00 : f32
      %16 = vector.broadcast %cst : f32 to vector<8x128xf32>
      %17 = arith.maximumf %15, %16 : vector<8x128xf32>
      %c0_9 = arith.constant 0 : index
      %c0_10 = arith.constant 0 : index
      %18 = vector.load %arg10[%c0_9, %c0_10] : memref<8x128xf32, #tpu.memory_space<vmem>>, vector<8x128xf32>
      tpu.vector_store %arg10[%c0_9, %c0_10], %17 {strides = array<i32>} : memref<8x128xf32, #tpu.memory_space<vmem>>, vector<8x128xf32>,
    } else {
    }
    %c1_i32_4 = arith.constant 1 : i32
    %9 = arith.cmpi sge, %arg2, %c1_i32_4 : i32
    %10 = arith.extui %9 : i1 to i32
    %c0_i32_5 = arith.constant 0 : i32
    %11 = arith.cmpi ne, %10, %c0_i32_5 : i32
    scf.if %11 {
      %c1_i32_6 = arith.constant 1 : i32
      %12 = arith.subi %arg2, %c1_i32_6 : i32
      %c128_i32 = arith.constant 128 : i32
      %13 = arith.muli %12, %c128_i32 : i32
      %14 = tpu.assume_multiple %13, 128 : i32
      %c0 = arith.constant 0 : index
      %c0_7 = arith.constant 0 : index
      %15 = vector.load %arg10[%c0, %c0_7] : memref<8x128xf32, #tpu.memory_space<vmem>>, vector<8x128xf32>
      %c0_8 = arith.constant 0 : index
      %c0_9 = arith.constant 0 : index
      %16 = vector.load %arg6[%c0_8, %c0_9] : memref<128x128xf32, #tpu.memory_space<vmem>>, vector<128x128xf32>
      %cst = arith.constant dense<0.000000e+00> : vector<8x128xf32>
      %17 = tpu.matmul %15, %16, %cst {dimension_numbers = #tpu.dot_dimension_numbers<[1], [0], [0], [1], [0, 0, 1, 1], [], []>} : vector<8x128xf32>, vector<128x128xf32>, vector<8x128xf32> -> vector<8x128xf32>
      %c0_i32_10 = arith.constant 0 : i32
      %18 = arith.cmpi eq, %arg1, %c0_i32_10 : i32
      %19 = arith.extui %18 : i1 to i32
      %c0_i32_11 = arith.constant 0 : i32
      %20 = arith.cmpi ne, %19, %c0_i32_11 : i32
      scf.if %20 {
        %c0_16 = arith.constant 0 : index
        %27 = arith.index_cast %14 : i32 to index
        %28 = vector.load %arg11[%c0_16, %27] : memref<8x128xf32, #tpu.memory_space<vmem>>, vector<8x128xf32>
        tpu.vector_store %arg11[%c0_16, %27], %17 {strides = array<i32>} : memref<8x128xf32, #tpu.memory_space<vmem>>, vector<8x128xf32>,
      } else {
      }
      %c0_i32_12 = arith.constant 0 : i32
      %21 = arith.cmpi sgt, %arg1, %c0_i32_12 : i32
      %22 = arith.extui %21 : i1 to i32
      %c0_i32_13 = arith.constant 0 : i32
      %23 = arith.cmpi ne, %22, %c0_i32_13 : i32
      scf.if %23 {
        %c0_16 = arith.constant 0 : index
        %27 = arith.index_cast %14 : i32 to index
        %28 = vector.load %arg11[%c0_16, %27] : memref<8x128xf32, #tpu.memory_space<vmem>>, vector<8x128xf32>
        %29 = arith.addf %28, %17 : vector<8x128xf32>
        %c0_17 = arith.constant 0 : index
        %30 = arith.index_cast %14 : i32 to index
        %31 = vector.load %arg11[%c0_17, %30] : memref<8x128xf32, #tpu.memory_space<vmem>>, vector<8x128xf32>
        tpu.vector_store %arg11[%c0_17, %30], %29 {strides = array<i32>} : memref<8x128xf32, #tpu.memory_space<vmem>>, vector<8x128xf32>,
      } else {
      }
      %c0_i32_14 = arith.constant 0 : i32
      %24 = arith.cmpi eq, %arg1, %c0_i32_14 : i32
      %25 = arith.extui %24 : i1 to i32
      %c0_i32_15 = arith.constant 0 : i32
      %26 = arith.cmpi ne, %25, %c0_i32_15 : i32
      scf.if %26 {
        %c0_16 = arith.constant 0 : index
        %27 = arith.index_cast %14 : i32 to index
        %28 = vector.load %arg11[%c0_16, %27] : memref<8x128xf32, #tpu.memory_space<vmem>>, vector<8x128xf32>
        %c0_17 = arith.constant 0 : index
        %c0_18 = arith.constant 0 : index
        %29 = vector.load %arg7[%c0_17, %c0_18] : memref<1x128xf32, #tpu.memory_space<vmem>>, vector<1x128xf32>
        %30 = vector.broadcast %29 : vector<1x128xf32> to vector<8x128xf32>
        %31 = arith.addf %28, %30 : vector<8x128xf32>
        %c0_19 = arith.constant 0 : index
        %c0_20 = arith.constant 0 : index
        %32 = vector.load %arg8[%c0_19, %c0_20] : memref<8x128xf32, #tpu.memory_space<vmem>>, vector<8x128xf32>
        tpu.vector_store %arg8[%c0_19, %c0_20], %31 {strides = array<i32>} : memref<8x128xf32, #tpu.memory_space<vmem>>, vector<8x128xf32>,
      } else {
      }
    } else {
    }
    return
  }
  func.func @transform_0(%arg0: i32, %arg1: i32, %arg2: i32) -> (i32, i32) {
    %c0_i32 = arith.constant 0 : i32
    %c0_i32_0 = arith.constant 0 : i32
    return %arg0, %c0_i32 : i32, i32
  }
  func.func @transform_1(%arg0: i32, %arg1: i32, %arg2: i32) -> (i32, i32) {
    %c0_i32 = arith.constant 0 : i32
    %0 = arith.minsi %arg2, %c0_i32 : i32
    %c0_i32_0 = arith.constant 0 : i32
    return %0, %arg1 : i32, i32
  }
  func.func @transform_2(%arg0: i32, %arg1: i32, %arg2: i32) -> (i32, i32) {
    %c0_i32 = arith.constant 0 : i32
    %c0_i32_0 = arith.constant 0 : i32
    return %c0_i32, %arg1 : i32, i32
  }
  func.func @transform_3(%arg0: i32, %arg1: i32, %arg2: i32) -> (i32, i32) {
    %c1_i32 = arith.constant 1 : i32
    %0 = arith.subi %arg2, %c1_i32 : i32
    %c0_i32 = arith.constant 0 : i32
    %1 = arith.maxsi %0, %c0_i32 : i32
    %c0_i32_0 = arith.constant 0 : i32
    return %arg1, %1 : i32, i32
  }
  func.func @transform_4(%arg0: i32, %arg1: i32, %arg2: i32) -> (i32, i32) {
    %c1_i32 = arith.constant 1 : i32
    %0 = arith.subi %arg2, %c1_i32 : i32
    %c0_i32 = arith.constant 0 : i32
    %1 = arith.maxsi %0, %c0_i32 : i32
    %c0_i32_0 = arith.constant 0 : i32
    %c0_i32_1 = arith.constant 0 : i32
    return %c0_i32_0, %1 : i32, i32
  }
  func.func @transform_5(%arg0: i32, %arg1: i32, %arg2: i32) -> (i32, i32) {
    %c0_i32 = arith.constant 0 : i32
    %0 = arith.cmpi eq, %arg1, %c0_i32 : i32
    %c1_i32 = arith.constant 1 : i32
    %1 = arith.subi %arg2, %c1_i32 : i32
    %c0_i32_0 = arith.constant 0 : i32
    %2 = arith.maxsi %1, %c0_i32_0 : i32
    %c0_i32_1 = arith.constant 0 : i32
    %3 = arith.select %0, %2, %c0_i32_1 : i32
    %c0_i32_2 = arith.constant 0 : i32
    return %arg0, %3 : i32, i32
  }
}

</mosaic_0001>

<bundles_post_ra>
// kernel: tpu_custom_call.1
= control target key start
LH: loop header
LB: loop body
LE: loop exit
PB: predicated region body
PF: predicated region fallthrough
CT: control target
= control target key end

     0   :  { %s1356_s0 = inlined_call_operand.hbm [shape: f32[8,128], index: 0, kind: input, shape index: {}]   ;;  %s1357_s1 = inlined_call_operand.hbm [shape: f32[128,128], index: 1, kind: input, shape index: {}]   ;;  %s1358_s2 = inlined_call_operand.vmem [shape: f32[1,128], index: 2, kind: input, shape index: {}]   ;;  %s1359_s3 = inlined_call_operand.hbm [shape: f32[128,128], index: 3, kind: input, shape index: {}]   ;;  %s1360_s4 = inlined_call_operand.vmem [shape: f32[1,128], index: 4, kind: input, shape index: {}]   ;;  %s1361_s5 = inlined_call_operand.hbm [shape: f32[8,128], index: 5, kind: output, shape index: {}]  }
   0x1   :  { %1365 = sst [smem:[#allocation16_spill]] %s1356_s0 }
   0x2   :  { %10 = vsyncpa [#allocation6], 0 }
   0x3   :  { %11 = vsyncpa [#allocation9], 0 }
   0x4   :  { %13 = vsyncpa [#allocation9 + $0x1], 0 }
   0x5   :  { %14 = vsyncpa [#allocation7], 0 }
   0x6   :  { %16 = vsyncpa [#allocation7 + $0x1], 0  ;;  %s1109_s18 = smov 0   ;;  %s1111_s19 = smov 0  }
   0x7   :  { %s1113_s20 = smov 0   ;;  %s1115_s21 = smov 0  }
   0x8   :  { %s1117_s22 = smov 0   ;;  %s1119_s23 = smov 0  }
   0x9   :  { %s1121_s24 = smov 0  }
   0xa LB: > { %s34_s25 = sadd.s32 1, %s1067_s23  ;;  %p1043_p1 = scmp.ne.s32.totalorder %s1059_s21, 0  ;;  %s1071_s24 = sphi %s1121_s24, %s22_s24   ;;  %s1067_s23 = sphi %s1119_s23, %s1381_s23   ;;  %s1063_s22 = sphi %s1117_s22, %s1380_s22   ;;  %s1059_s21 = sphi %s1115_s21, %s1346_s21   ;;  %s1055_s20 = sphi %s1113_s20, %s1379_s20   ;;  %s1051_s19 = sphi %s1111_s19, %s1341_s19   ;;  %s1047_s18 = sphi %s1109_s18, %s1378_s18  }
   0xb   : > { %p35_p0 = scmp.ge.s32.totalorder %s34_s25, 2  ;;  %p88_p2 = scmp.eq.s32.totalorder %s1071_s24, 0 }
   0xc   : > { %p1362_p5 = scmp.lt.s32.totalorder %s1071_s24, 2  ;;  %s267_s26 = sand.u32 1, %s1071_s24  }
   0xd   : > { %s1383_s25 = smov (%p35_p0, %s34_s25), 0  ;;  %p89_p4 = por %p1043_p1, %p88_p2 }
   0xe   : > { %s1073_s27 = smov [#allocation8]   ;;  %s280_s6 = sshll.u32 %s1357_s1, 4  ;;  %s281_s6 = int_to_ptr.hbm [resolvable:$true] %s280_s6 }
   0xf   : > { %s282_s28 = sshll.u32 %s1073_s27, 4  ;;  %p1159_p6 = pnand %p1362_p5, %p89_p4  ;;  %s283_s28 = int_to_ptr.vmem [resolvable:$true] %s282_s28 }
  0x10   : > { %s1163_s8 = scalar_lea.sflag [#allocation9], %s267_s26  ;;  %s873_s9 = sshra.s32 %s281_s6, 4  ;;  %s874_s9 = int_to_ptr.hbm [resolvable:$true] %s873_s9 }
  0x11   : > { %s875_s10 = scalar_lea.hbm %s874_s9, 128  ;;  %p877_p8 = pneg %p1159_p6 }
  0x12   : > { %p876_p7 = scmp.ne.s32.totalorder %s874_s9, %s875_s10  ;;  %s880_s13 = scalar_lea.hbm %s1357_s1, 128 }
  0x13   : > { %p882_p11 = scmp.lt.s32.totalorder %s880_s13, %s875_s10 }
  0x14   : > { %p878_p9 = pnand %p877_p8, %p876_p7 }
  0x16   : > { %p879_p10 = pneg %p878_p9 }
  0x18   : > { %p884_p12 = pnand %p882_p11, %p879_p10 }
  0x1a   : > { %887 = shalt.err (!%p884_p12)
}
  0x1b   : > { %s1363_s14 = smov 128   ;;  %s1364_s15 = smov 8  }
  0x1c   : > { %783 = dma.hbm_to_vmem [thread:$0]  (!%p1159_p6), %s281_s6, 2048, %s283_s28, %s1163_s8, %s1363_s14, %s1363_s14, %s1364_s15  }
  0x1d   : > { %s1177_s16 = sadd.s32 4294967295, %s1071_s24   ;;  %s725_s17 = sadd.s32 4294967294, %s1071_s24  }
  0x1e   : > { %p93_p13 = scmp.ne.s32.totalorder %s1059_s21, %s1055_s20  ;;  %p94_p0 = scmp.eq.s32.totalorder %s1177_s16, 0 }
  0x1f   : > { %p1044_p1 = scmp.ne.s32.totalorder %s1051_s19, 0  ;;  %p153_p4 = scmp.ne.s32.totalorder %s1051_s19, %s1047_s18 }
  0x20   : > { %p221_p7 = scmp.eq.s32.totalorder %s1177_s16, 1  ;;  %p1189_p8 = por %p94_p0, %p93_p13 }
  0x21   : > { %p149_p6 = por %p1044_p1, %p88_p2  ;;  %p1197_p9 = por %p153_p4, %p94_p0 }
  0x22   : > { %p1201_p10 = por %p1044_p1, %p221_p7  ;;  %p227_p11 = scmp.eq.s32.totalorder %s725_s17, 1 }
  0x23   : > { %p732_p12 = scmp.ge.s32.totalorder %s1071_s24, 1  ;;  %p234_p3 = scmp.lt.s32.totalorder %s1071_s24, 3 }
  0x24   : > { %p1207_p5 = por %p227_p11, %p153_p4  ;;  %s1371_s0 = sld [smem:[#allocation16_spill]] }
  0x25   : > { %p1214_p2 = pnand %p732_p12, %p234_p3  ;;  %p1373_p13 = scmp.lt.s32.totalorder %s1071_s24, 2 }
  0x26   : > { %s1076_s10 = smov [#allocation5]   ;;  %s1077_s12 = smov [#allocation10]  }
  0x27   : > { %p1220_p1 = pnand %p1373_p13, %p149_p6  ;;  %p776_p4 = pneg %p1214_p2 }
  0x28   : > { %s250_s11 = sshll.u32 %s1076_s10, 4  ;;  %s308_s13 = sshll.u32 %s1077_s12, 4  ;;  %s251_s11 = int_to_ptr.vmem [resolvable:$true] %s250_s11  ;;  %s309_s13 = int_to_ptr.vmem [resolvable:$true] %s308_s13 }
  0x29   : > { %p777_p7 = pnand %p776_p4, %p94_p0  ;;  %s306_s30 = sshll.u32 %s1359_s3, 4  ;;  %s307_s30 = int_to_ptr.hbm [resolvable:$true] %s306_s30 }
  0x2a   : > { %s248_s6 = sshll.u32 %s1371_s0, 4  ;;  %s933_s14 = sshra.s32 %s307_s30, 4  ;;  %s249_s6 = int_to_ptr.hbm [resolvable:$true] %s248_s6  ;;  %s934_s14 = int_to_ptr.hbm [resolvable:$true] %s933_s14 }
  0x2b   : > { %779 = dma.hbm_to_vmem [thread:$0]  (!%p777_p7), %s249_s6, 128, %s251_s11, [#allocation6]  }
  0x2c   : > { %s935_s15 = scalar_lea.hbm %s934_s14, 128  ;;  %p937_p6 = pneg %p1220_p1 }
  0x2d   : > { %p936_p3 = scmp.ne.s32.totalorder %s934_s14, %s935_s15  ;;  %p941_p13 = scmp.lt.s32.totalorder %s934_s14, %s1359_s3 }
  0x2f   : > { %p938_p11 = pnand %p937_p6, %p936_p3 }
  0x31   : > { %p939_p12 = pneg %p938_p11 }
  0x33   : > { %p944_p4 = pnand %p941_p13, %p939_p12 }
  0x35   : > { %947 = shalt.err (!%p944_p4)
}
  0x36   : > { %s1375_s6 = smov 8   ;;  %s1376_s11 = smov 128  }
  0x37   : > { %786 = dma.hbm_to_vmem [thread:$0]  (!%p1220_p1), %s307_s30, 2048, %s309_s13, %s1163_s8, %s1376_s11, %s1376_s11, %s1375_s6  }
  0x38   : > { %332 = sbr.rel (%p1214_p2) target bundleno = 446 (0x1be), region = 40 }
  0x3d   : > { %1028 = dma.done.wait (%p94_p0), [#allocation6], 128  }
  0x3e   : > { %1030 = vsyncadd (%p94_p0), [#allocation6], 4294967168  ;;  %s339_s0 = sand.u32 1, %s1177_s16   ;;  %s341_s14 = sand.u32 1, %s1059_s21  }
  0x3f   : > { %s744_s15 = sshll.u32 %s341_s14, 7  ;;  %s340_s9 = scalar_lea.sflag [#allocation9], %s339_s0 }
  0x40   : > { %s1250_s12 = scalar_lea.vmem [#allocation8], %s744_s15 }
  0x41   : > { %1032 = dma.done.wait (%p1189_p8), %s340_s9, 2048  }
  0x42   : > { %1034 = vsyncadd (%p1189_p8), %s340_s9, 4294965248  ;;  %s1257_s8 = sand.u32 1, %s1051_s19  }
  0x43   : > { %s745_s7 = sshll.u32 %s1257_s8, 7 }
  0x44   : > { %s1260_s13 = scalar_lea.vmem [#allocation10], %s745_s7 }
  0x45   : > { %1036 = dma.done.wait (%p1197_p9), %s340_s9, 2048  }
  0x46   : > { %1038 = vsyncadd (%p1197_p9), %s340_s9, 4294965248  ;;  %s746_s16 = sshll.u32 %s1257_s8, 3  ;;  %p753_p0 = scmp.ne.s32.totalorder %s1063_s22, 0 }
  0x47   : > { %s1267_s17 = scalar_lea.vmem [#allocation11], %s746_s16 }
  0x48   : > { %422 = sbr.rel (%p753_p0) target bundleno = 79 (0x4f), region = 56 }
  0x4d   : > { %v1078_v0 = vmov 0.0  }
  0x4e   : > { %423 = vst [vmem:[#allocation2] sm:$0xff] %v1078_v0 }
  0x4f PF: > { %p754_p8 = scmp.ge.s32.totalorder %s1063_s22, 1 }
  0x50   : > { %s755_s26 = sshll.u32 (!%p754_p8), %s1063_s22, 7 }
  0x51   : > { %427 = sbr.rel (%p754_p8) target bundleno = 247 (0xf7), region = 60  ;;  %s429_s27 = sshra.s32 (!%p754_p8), %s755_s26, 7 }
  0x52   : > { %s431_s29 = scalar_lea.vmem (!%p754_p8), [#allocation5], %s429_s27 }
  0x56   : > { %v449_v1 = vld [vmem:[%s1250_s12 + $0x78] sm:$0xff]  ;;  %v448_v2 = vld [vmem:[%s1250_s12 + $0x70] sm:$0xff]  ;;  %v447_v3 = vld [vmem:[%s1250_s12 + $0x68] sm:$0xff] }
  0x57   : > { %450 = vmatpush.msra.mxu0 %v449_v1  ;;  %v446_v4 = vld [vmem:[%s1250_s12 + $0x60] sm:$0xff]  ;;  %v445_v5 = vld [vmem:[%s1250_s12 + $0x58] sm:$0xff]  ;;  %v444_v6 = vld [vmem:[%s1250_s12 + $0x50] sm:$0xff] }
  0x58   : > { %v443_v7 = vld [vmem:[%s1250_s12 + $0x48] sm:$0xff]  ;;  %v442_v8 = vld [vmem:[%s1250_s12 + $0x40] sm:$0xff]  ;;  %v441_v9 = vld [vmem:[%s1250_s12 + $0x38] sm:$0xff] }
  0x59   : > { %451 = vmatpush.msra.mxu0 %v448_v2  ;;  %v440_v10 = vld [vmem:[%s1250_s12 + $0x30] sm:$0xff]  ;;  %v439_v11 = vld [vmem:[%s1250_s12 + $0x28] sm:$0xff]  ;;  %v438_v12 = vld [vmem:[%s1250_s12 + $0x20] sm:$0xff] }
  0x5a   : > { %v437_v13 = vld [vmem:[%s1250_s12 + $0x18] sm:$0xff]  ;;  %v436_v14 = vld [vmem:[%s1250_s12 + $0x10] sm:$0xff]  ;;  %v435_v15 = vld [vmem:[%s1250_s12 + $0x8] sm:$0xff] }
  0x5b   : > { %452 = vmatpush.msra.mxu0 %v447_v3  ;;  %v434_v16 = vld [vmem:[%s1250_s12] sm:$0xff]  ;;  %v432_v17 = vld [vmem:[%s431_s29] sm:$0xff] }
  0x5c   : > { %v433_v18 = vld [vmem:[#allocation2] sm:$0xff] }
  0x5d   : > { %453 = vmatpush.msra.mxu0 %v446_v4 }
  0x5f   : > { %454 = vmatpush.msra.mxu0 %v445_v5 }
  0x61   : > { %455 = vmatpush.msra.mxu0 %v444_v6 }
  0x63   : > { %456 = vmatpush.msra.mxu0 %v443_v7 }
  0x65   : > { %457 = vmatpush.msra.mxu0 %v442_v8 }
  0x67   : > { %458 = vmatpush.msra.mxu0 %v441_v9 }
  0x69   : > { %459 = vmatpush.msra.mxu0 %v440_v10 }
  0x6b   : > { %460 = vmatpush.msra.mxu0 %v439_v11 }
  0x6d   : > { %461 = vmatpush.msra.mxu0 %v438_v12 }
  0x6f   : > { %462 = vmatpush.msra.mxu0 %v437_v13 }
  0x71   : > { %463 = vmatpush.msra.mxu0 %v436_v14 }
  0x73   : > { %464 = vmatpush.msra.mxu0 %v435_v15 }
  0x75   : > { %465 = vmatpush.msra.mxu0 %v434_v16 }
  0x76   : > { %466 = vmatmul.f32.vlgmr.msra.gmra.mxu0 %v432_v17 }
  0xf3   : > { %v467_v19 = vpop.f32.mrf.mxu0 }
  0xf4   : > { %v470_v20 = vadd.f32 %v467_v19, %v433_v18 }
  0xf6   : > { %471 = vst [vmem:[#allocation2] sm:$0xff] %v470_v20 }
  0xf7 PF: > { %474 = sbr.rel (%p753_p0) target bundleno = 259 (0x103), region = 64 }
  0xfc   : > { %v871_v22 = vld [vmem:[%s1358_s2] ss:$0 sm:$0xff] }
  0xfd   : > { %v475_v21 = vld [vmem:[#allocation2] sm:$0xff] }
  0xfe   : > { %v480_v23 = vadd.f32 %v871_v22, %v475_v21 }
 0x100   : > { %v481_v24 = vmax.f32 %v480_v23, 0.0 }
 0x102   : > { %482 = vst [vmem:[#allocation3] sm:$0xff] %v481_v24 }
 0x103 PF: > { %p757_p9 = scmp.lt.s32.totalorder %s1063_s22, 1 }
 0x105   : > { %486 = sbr.rel (%p757_p9) target bundleno = 427 (0x1ab), region = 68 }
 0x10a   : > { %v505_v25 = vld [vmem:[%s1260_s13 + $0x78] sm:$0xff]  ;;  %v504_v26 = vld [vmem:[%s1260_s13 + $0x70] sm:$0xff]  ;;  %v503_v27 = vld [vmem:[%s1260_s13 + $0x68] sm:$0xff] }
 0x10b   : > { %506 = vmatpush.msra.mxu0 %v505_v25  ;;  %v502_v28 = vld [vmem:[%s1260_s13 + $0x60] sm:$0xff]  ;;  %v501_v29 = vld [vmem:[%s1260_s13 + $0x58] sm:$0xff]  ;;  %v500_v30 = vld [vmem:[%s1260_s13 + $0x50] sm:$0xff] }
 0x10c   : > { %v499_v31 = vld [vmem:[%s1260_s13 + $0x48] sm:$0xff]  ;;  %v498_v32 = vld [vmem:[%s1260_s13 + $0x40] sm:$0xff]  ;;  %v497_v33 = vld [vmem:[%s1260_s13 + $0x38] sm:$0xff] }
 0x10d   : > { %507 = vmatpush.msra.mxu0 %v504_v26  ;;  %v496_v34 = vld [vmem:[%s1260_s13 + $0x30] sm:$0xff]  ;;  %v495_v35 = vld [vmem:[%s1260_s13 + $0x28] sm:$0xff]  ;;  %v494_v36 = vld [vmem:[%s1260_s13 + $0x20] sm:$0xff] }
 0x10e   : > { %v493_v37 = vld [vmem:[%s1260_s13 + $0x18] sm:$0xff]  ;;  %v492_v38 = vld [vmem:[%s1260_s13 + $0x10] sm:$0xff]  ;;  %v491_v39 = vld [vmem:[%s1260_s13 + $0x8] sm:$0xff] }
 0x10f   : > { %508 = vmatpush.msra.mxu0 %v503_v27  ;;  %v490_v40 = vld [vmem:[%s1260_s13] sm:$0xff]  ;;  %v489_v41 = vld [vmem:[#allocation3] sm:$0xff]  ;;  %v872_v42 = vld [vmem:[%s1360_s4] ss:$0 sm:$0xff] }
 0x111   : > { %509 = vmatpush.msra.mxu0 %v502_v28 }
 0x113   : > { %510 = vmatpush.msra.mxu0 %v501_v29 }
 0x115   : > { %511 = vmatpush.msra.mxu0 %v500_v30 }
 0x117   : > { %512 = vmatpush.msra.mxu0 %v499_v31 }
 0x119   : > { %513 = vmatpush.msra.mxu0 %v498_v32 }
 0x11b   : > { %514 = vmatpush.msra.mxu0 %v497_v33 }
 0x11d   : > { %515 = vmatpush.msra.mxu0 %v496_v34 }
 0x11f   : > { %516 = vmatpush.msra.mxu0 %v495_v35 }
 0x121   : > { %517 = vmatpush.msra.mxu0 %v494_v36 }
 0x123   : > { %518 = vmatpush.msra.mxu0 %v493_v37 }
 0x125   : > { %519 = vmatpush.msra.mxu0 %v492_v38 }
 0x127   : > { %520 = vmatpush.msra.mxu0 %v491_v39 }
 0x129   : > { %521 = vmatpush.msra.mxu0 %v490_v40 }
 0x12a   : > { %522 = vmatmul.f32.vlgmr.msra.gmra.mxu0 %v489_v41 }
 0x1a7   : > { %v523_v43 = vpop.f32.mrf.mxu0 }
 0x1a8   : > { %v555_v44 = vadd.f32 %v872_v42, %v523_v43 }
 0x1aa   : > { %556 = vst [vmem:[%s1267_s17] sm:$0xff] %v555_v44 }
 0x1ab PF: > { %s761_s0 = sadd.s32 4294967295, %s1063_s22  ;;  %s576_s14 = sshll.u32 %s1267_s17, 4  ;;  %s577_s14 = int_to_ptr.vmem [resolvable:$true] %s576_s14 }
 0x1ac   : > { %p567_p2 = scmp.gt.s32.totalorder %s761_s0, 0  ;;  %s558_s16 = scalar_lea.sflag [#allocation7], %s1257_s8 }
 0x1ad   : > { %s983_s17 = scalar_lea.hbm %s1361_s5, 8 }
 0x1ae   : > { %s1385_s0 = smov (!%p567_p2, %s761_s0), 0 }
 0x1af   : > { %s762_s15 = sshll.u32 %s1385_s0, 3 }
 0x1b0   : > { %s574_s7 = scalar_lea.hbm %s1361_s5, %s762_s15 }
 0x1b1   : > { %s578_s13 = sshll.u32 %s574_s7, 4  ;;  %s579_s13 = int_to_ptr.hbm [resolvable:$true] %s578_s13 }
 0x1b2   : > { %s977_s26 = sshra.s32 %s579_s13, 4  ;;  %s978_s26 = int_to_ptr.hbm [resolvable:$true] %s977_s26 }
 0x1b3   : > { %s979_s27 = scalar_lea.hbm %s978_s26, 8  ;;  %p984_p6 = scmp.lt.s32.totalorder %s978_s26, %s1361_s5 }
 0x1b4   : > { %p980_p1 = scmp.ne.s32.totalorder %s978_s26, %s979_s27  ;;  %p985_p11 = scmp.lt.s32.totalorder %s983_s17, %s979_s27 }
 0x1b6   : > { %p981_p7 = pnand %p980_p1, %p1201_p10  ;;  %p986_p12 = por %p985_p11, %p984_p6 }
 0x1b8   : > { %p982_p3 = pneg %p981_p7 }
 0x1ba   : > { %p987_p13 = pnand %p986_p12, %p982_p3 }
 0x1bc   : > { %990 = shalt.err (!%p987_p13)
}
 0x1bd   : > { %774 = dma.vmem_to_hbm [thread:$0]  (%p1201_p10), %s577_s14, 128, %s579_s13, %s558_s16  }
 0x1be PF: > { %s590_s8 = sand.u32 1, %s1047_s18   ;;  %p1377_p4 = scmp.ge.s32.totalorder %s1071_s24, 2 }
 0x1bf   : > { %s591_s6 = scalar_lea.sflag [#allocation7], %s590_s8 }
 0x1c0   : > { %p788_p0 = pnand %p1377_p4, %p1207_p5 }
 0x1c2   : > { %p789_p8 = pneg %p788_p0 }
 0x1c4   : > { %1040 = dma.done.wait (%p789_p8), %s591_s6, 128  }
 0x1c5   : > { %1042 = vsyncadd (%p789_p8), %s591_s6, 4294967168  ;;  %s22_s24 = sadd.s32 1, %s1071_s24   ;;  %s1378_s18 = smov %s1051_s19 }
 0x1c6   : > { %p19_p9 = scmp.ge.s32.totalorder %s22_s24, 4   ;;  %s1341_s19 = smov 0  }
 0x1c7   : > { %s1379_s20 = smov %s1059_s21  ;;  %s1346_s21 = smov 0  }
 0x1c8   : > { %s1380_s22 = smov %s1067_s23  ;;  %s1381_s23 = smov %s1383_s25 }
 0x1c9   :  { %21 = sbr.rel (!%p19_p9) target bundleno = 10 (0xa), region = 140 }
 0x1ce   :  { %597 = vsyncpa [#allocation6], 1 }
 0x1cf   :  { %599 = vsyncpa [#allocation6 + $0x1], 1 }
 0x1d0   :  { %600 = vsyncpa [#allocation9], 1 }
 0x1d1   :  { %602 = vsyncpa [#allocation9 + $0x1], 1 }
 0x1d2   :  { %603 = vsyncpa [#allocation7], 1 }
 0x1d3   :  { %605 = vsyncpa [#allocation7 + $0x1], 1 }

</bundles_post_ra>
